<compile_context>
chip_gen: v5e
topology: v5e:2x2
jax: 0.10.0
libtpu: 0.0.40
codegen_flags: <defaults>
</compile_context>

<pallas_src>
import functools
import math

import jax
import jax.numpy as jnp
from jax import lax
from jax.experimental import pallas as pl
from jax.experimental.pallas import tpu as pltpu


def _rnn_fc_kernel(x_ref, wih_ref, whh_ref, b_ref, wfc_ref, bfc_ref,
                   out_ref, xw_ref, *, hidden_size, seq_len, fc_start):
    """tanh-RNN over time + Linear on the tail window, time-major layout.

    x_ref   : (Tp, Bp, Ip)  f32  time-major input (zero-padded)
    wih_ref : (Ip, Hp)      f32  W_ih^T
    whh_ref : (Hp, Hp)      f32  W_hh^T
    b_ref   : (1, Hp)       f32  b_ih + b_hh
    wfc_ref : (Hp, Op)      f32  W_fc^T
    bfc_ref : (1, Op)       f32
    out_ref : (Lr, Bp, Op)  f32  FC of hidden states t in [fc_start, Tp)
    xw_ref  : (Tp, Bp, Hp)  f32  VMEM scratch (input projection, then hidden states)
    """
    Tp, Bp, Ip = x_ref.shape
    Hp = whh_ref.shape[0]
    Op = wfc_ref.shape[1]
    Lr = out_ref.shape[0]

    # ---- (1) Input projection hoisted out of the recurrence: one MXU matmul.
    #      Bias folded in here so the loop has no per-step bias broadcast.
    #      (Tp, Bp, Ip) -> (Tp*Bp, Ip) is a layout no-op (Bp is a sublane
    #      multiple, Ip a lane multiple).
    x_all = x_ref[...].reshape(Tp * Bp, Ip)
    xw = jnp.dot(x_all, wih_ref[...],
                 preferred_element_type=jnp.float32) + b_ref[...]
    xw_ref[...] = xw.reshape(Tp, Bp, Hp)

    # ---- (2) Recurrence over the `seq_len` real timesteps only:
    #      h_t = tanh(xw_t + h_{t-1} @ W_hh).
    use_vpu = hidden_size <= 8
    if use_vpu:
        # Tiny H: keep the H live rows of W_hh broadcast in vregs (hoisted)
        # and do the recurrent "matmul" as H VPU broadcast multiply-adds per
        # step — no MXU round trip on the serial critical path.
        whh = whh_ref[...]
        whh_rows = [jnp.broadcast_to(whh[j:j + 1, :], (Bp, Hp))
                    for j in range(hidden_size)]

        def step(t, h):
            pre = xw_ref[t]                                       # (Bp, Hp)
            for j in range(hidden_size):
                pre = pre + h[:, j:j + 1] * whh_rows[j]
            h_new = jnp.tanh(pre)
            xw_ref[pl.ds(t, 1)] = h_new[None]                     # stash hidden state
            return h_new
    else:
        whh = whh_ref[...]                                        # hoisted load

        def step(t, h):
            pre = xw_ref[t] + jnp.dot(h, whh,
                                      preferred_element_type=jnp.float32)
            h_new = jnp.tanh(pre)
            xw_ref[pl.ds(t, 1)] = h_new[None]
            return h_new

    h0 = jnp.zeros((Bp, Hp), jnp.float32)                         # PyTorch default h_0 = 0
    lax.fori_loop(0, seq_len, step, h0, unroll=True)              # short static loop: unroll

    # ---- (3) FC hoisted out of the loop and restricted to the tail window
    #      that covers the last `output_length` real timesteps: one MXU
    #      matmul, single lane-dense writeback (Op is a multiple of 128).
    hs = xw_ref[pl.ds(fc_start, Lr)].reshape(Lr * Bp, Hp)
    y = jnp.dot(hs, wfc_ref[...],
                preferred_element_type=jnp.float32) + bfc_ref[...]
    out_ref[...] = y.reshape(Lr, Bp, Op)


def _round_up(n, m):
    return ((n + m - 1) // m) * m


def build_rnn_forward(w_ih, w_hh, b_ih, b_hh, w_fc, b_fc, output_length):
    """One-time parameter prep; returns a jitted forward: x (B,T,I) -> (B,L,O).

    w_ih : (H, I), w_hh : (H, H), b_ih/b_hh : (H,)   -- nn.RNN params
    w_fc : (O, H), b_fc : (O,)                       -- nn.Linear params
    """
    H, I = w_ih.shape
    O = w_fc.shape[0]
    L = int(output_length)

    Ip = _round_up(I, 128)
    Hp = _round_up(H, 128)
    Op = _round_up(O, 128)

    # One-time transpose / cast / pad (constant across calls).
    wih_p = jnp.pad(jnp.asarray(w_ih, jnp.float32).T, ((0, Ip - I), (0, Hp - H)))
    whh_p = jnp.pad(jnp.asarray(w_hh, jnp.float32).T, ((0, Hp - H), (0, Hp - H)))
    b_p = jnp.pad(jnp.asarray(b_ih + b_hh, jnp.float32)[None, :],
                  ((0, 0), (0, Hp - H)))
    wfc_p = jnp.pad(jnp.asarray(w_fc, jnp.float32).T, ((0, Hp - H), (0, Op - O)))
    bfc_p = jnp.pad(jnp.asarray(b_fc, jnp.float32)[None, :], ((0, 0), (0, Op - O)))

    @jax.jit
    def forward(x):
        B, T, Iin = x.shape
        assert Iin == I and T >= L
        Bp = _round_up(B, 8)
        Tp = _round_up(T, 8)

        # FC is applied only to timesteps [fc_start, Tp); the first L rows of
        # the kernel output are exactly the last L real timesteps.
        fc_start = T - L
        Lr = Tp - fc_start

        # Time padding goes at the END so it never feeds a real hidden state.
        x_p = jnp.pad(x.astype(jnp.float32),
                      ((0, Bp - B), (0, Tp - T), (0, Ip - I)))
        x_tm = jnp.transpose(x_p, (1, 0, 2))                      # (Tp, Bp, Ip) time-major

        kernel = functools.partial(_rnn_fc_kernel, hidden_size=H,
                                   seq_len=T, fc_start=fc_start)

        out_tm = pl.pallas_call(
            kernel,
            out_shape=jax.ShapeDtypeStruct((Lr, Bp, Op), jnp.float32),
            in_specs=[pl.BlockSpec(memory_space=pltpu.MemorySpace.VMEM)] * 6,
            out_specs=pl.BlockSpec(memory_space=pltpu.MemorySpace.VMEM),
            scratch_shapes=[pltpu.VMEM((Tp, Bp, Hp), jnp.float32)],
        )(x_tm, wih_p, whh_p, b_p, wfc_p, bfc_p)

        # First L rows are the last L *real* timesteps; drop batch/feature
        # padding and go back to batch-first.
        y = out_tm[:L, :B, :O]                                    # (L, B, O)
        return jnp.transpose(y, (1, 0, 2))                        # (B, L, O)

    return forward


def rnn_forward_ref(x, w_ih, w_hh, b_ih, b_hh, w_fc, b_fc, output_length):
    """Pure-JAX reference (mirrors torch.nn.RNN + Linear)."""
    B, T, I = x.shape
    H = w_hh.shape[0]

    def step(h, x_t):
        h_new = jnp.tanh(x_t @ w_ih.T + b_ih + h @ w_hh.T + b_hh)
        return h_new, h_new

    h0 = jnp.zeros((B, H), jnp.float32)
    _, hs = lax.scan(step, h0, jnp.swapaxes(x, 0, 1))
    hs = jnp.swapaxes(hs, 0, 1)                     # (B, T, H)
    return hs[:, -output_length:, :] @ w_fc.T + b_fc


if __name__ == "__main__":
    # Module hyper-parameters (from the PyTorch script).
    input_size, hidden_size, output_size, output_length = 2, 3, 1, 10
    B, T = 2, 16  # small batch / sequence (T >= output_length)

    key = jax.random.PRNGKey(0)
    kx, kp = jax.random.split(key)
    x = jax.random.normal(kx, (B, T, input_size), dtype=jnp.float32)

    # Deterministic parameter init (same distribution as PyTorch's default
    # uniform(-1/sqrt(H), 1/sqrt(H)); exact values are synthetic).
    bound = 1.0 / math.sqrt(hidden_size)
    ks = jax.random.split(kp, 6)
    w_ih = jax.random.uniform(ks[0], (hidden_size, input_size), jnp.float32, -bound, bound)
    w_hh = jax.random.uniform(ks[1], (hidden_size, hidden_size), jnp.float32, -bound, bound)
    b_ih = jax.random.uniform(ks[2], (hidden_size,), jnp.float32, -bound, bound)
    b_hh = jax.random.uniform(ks[3], (hidden_size,), jnp.float32, -bound, bound)
    w_fc = jax.random.uniform(ks[4], (output_size, hidden_size), jnp.float32, -bound, bound)
    b_fc = jax.random.uniform(ks[5], (output_size,), jnp.float32, -bound, bound)

    forward = build_rnn_forward(w_ih, w_hh, b_ih, b_hh, w_fc, b_fc, output_length)
    y = jax.block_until_ready(forward(x))

    y_ref = rnn_forward_ref(x, w_ih, w_hh, b_ih, b_hh, w_fc, b_fc, output_length)
    assert y.shape == (B, output_length, output_size), y.shape
    assert jnp.max(jnp.abs(y - y_ref)) < 5e-5, "mismatch vs pure-JAX reference"

    print("KERNEL_OK")
</pallas_src>

<mosaic_0001>
module attributes {stable_mosaic.version = 11 : i64} {
  func.func @_rnn_fc_kernel(%arg0: memref<16x8x128xf32, #tpu.memory_space<vmem>>, %arg1: memref<128x128xf32, #tpu.memory_space<vmem>>, %arg2: memref<128x128xf32, #tpu.memory_space<vmem>>, %arg3: memref<1x128xf32, #tpu.memory_space<vmem>>, %arg4: memref<128x128xf32, #tpu.memory_space<vmem>>, %arg5: memref<1x128xf32, #tpu.memory_space<vmem>>, %arg6: memref<10x8x128xf32, #tpu.memory_space<vmem>>, %arg7: memref<16x8x128xf32, #tpu.memory_space<vmem>>) attributes {dimension_semantics = [], scalar_prefetch = 0 : i64, scratch_operands = 1 : i64, tpu.core_type = #tpu.core_type<tc>} {
    %c0 = arith.constant 0 : index
    %c0_0 = arith.constant 0 : index
    %c0_1 = arith.constant 0 : index
    %0 = vector.load %arg0[%c0, %c0_0, %c0_1] : memref<16x8x128xf32, #tpu.memory_space<vmem>>, vector<16x8x128xf32>
    %1 = vector.shape_cast %0 : vector<16x8x128xf32> to vector<128x128xf32>
    %c0_2 = arith.constant 0 : index
    %c0_3 = arith.constant 0 : index
    %2 = vector.load %arg1[%c0_2, %c0_3] : memref<128x128xf32, #tpu.memory_space<vmem>>, vector<128x128xf32>
    %cst = arith.constant dense<0.000000e+00> : vector<128x128xf32>
    %3 = tpu.matmul %1, %2, %cst {dimension_numbers = #tpu.dot_dimension_numbers<[1], [0], [0], [1], [0, 0, 1, 1], [], []>} : vector<128x128xf32>, vector<128x128xf32>, vector<128x128xf32> -> vector<128x128xf32>
    %c0_4 = arith.constant 0 : index
    %c0_5 = arith.constant 0 : index
    %4 = vector.load %arg3[%c0_4, %c0_5] : memref<1x128xf32, #tpu.memory_space<vmem>>, vector<1x128xf32>
    %5 = vector.broadcast %4 : vector<1x128xf32> to vector<128x128xf32>
    %6 = arith.addf %3, %5 : vector<128x128xf32>
    %7 = vector.shape_cast %6 : vector<128x128xf32> to vector<16x8x128xf32>
    %c0_6 = arith.constant 0 : index
    %c0_7 = arith.constant 0 : index
    %c0_8 = arith.constant 0 : index
    %8 = vector.load %arg7[%c0_6, %c0_7, %c0_8] : memref<16x8x128xf32, #tpu.memory_space<vmem>>, vector<16x8x128xf32>
    tpu.vector_store %arg7[%c0_6, %c0_7, %c0_8], %7 {strides = array<i32>} : memref<16x8x128xf32, #tpu.memory_space<vmem>>, vector<16x8x128xf32>,
    %c0_9 = arith.constant 0 : index
    %c0_10 = arith.constant 0 : index
    %9 = vector.load %arg2[%c0_9, %c0_10] : memref<128x128xf32, #tpu.memory_space<vmem>>, vector<128x128xf32>
    %10 = vector.extract_strided_slice %9 {offsets = [0, 0], sizes = [1, 128], strides = [1, 1]} : vector<128x128xf32> to vector<1x128xf32>
    %11 = vector.shape_cast %10 : vector<1x128xf32> to vector<1x128xf32>
    %12 = vector.broadcast %11 : vector<1x128xf32> to vector<8x128xf32>
    %13 = vector.extract_strided_slice %9 {offsets = [1, 0], sizes = [1, 128], strides = [1, 1]} : vector<128x128xf32> to vector<1x128xf32>
    %14 = vector.shape_cast %13 : vector<1x128xf32> to vector<1x128xf32>
    %15 = vector.broadcast %14 : vector<1x128xf32> to vector<8x128xf32>
    %16 = vector.extract_strided_slice %9 {offsets = [2, 0], sizes = [1, 128], strides = [1, 1]} : vector<128x128xf32> to vector<1x128xf32>
    %17 = vector.shape_cast %16 : vector<1x128xf32> to vector<1x128xf32>
    %18 = vector.broadcast %17 : vector<1x128xf32> to vector<8x128xf32>
    %cst_11 = arith.constant 0.000000e+00 : f32
    %19 = vector.broadcast %cst_11 : f32 to vector<8x128xf32>
    %c0_i32 = arith.constant 0 : i32
    %20 = arith.index_cast %c0_i32 : i32 to index
    %c0_12 = arith.constant 0 : index
    %c0_13 = arith.constant 0 : index
    %21 = vector.load %arg7[%20, %c0_12, %c0_13] : memref<16x8x128xf32, #tpu.memory_space<vmem>>, vector<1x8x128xf32>
    %22 = vector.shape_cast %21 : vector<1x8x128xf32> to vector<8x128xf32>
    %23 = vector.extract_strided_slice %19 {offsets = [0, 0], sizes = [8, 1], strides = [1, 1]} : vector<8x128xf32> to vector<8x1xf32>
    %24 = vector.broadcast %23 : vector<8x1xf32> to vector<8x128xf32>
    %25 = arith.mulf %24, %12 : vector<8x128xf32>
    %26 = arith.addf %22, %25 : vector<8x128xf32>
    %27 = vector.extract_strided_slice %19 {offsets = [0, 1], sizes = [8, 1], strides = [1, 1]} : vector<8x128xf32> to vector<8x1xf32>
    %28 = vector.broadcast %27 : vector<8x1xf32> to vector<8x128xf32>
    %29 = arith.mulf %28, %15 : vector<8x128xf32>
    %30 = arith.addf %26, %29 : vector<8x128xf32>
    %31 = vector.extract_strided_slice %19 {offsets = [0, 2], sizes = [8, 1], strides = [1, 1]} : vector<8x128xf32> to vector<8x1xf32>
    %32 = vector.broadcast %31 : vector<8x1xf32> to vector<8x128xf32>
    %33 = arith.mulf %32, %18 : vector<8x128xf32>
    %34 = arith.addf %30, %33 : vector<8x128xf32>
    %35 = math.tanh %34 : vector<8x128xf32>
    %36 = vector.shape_cast %35 : vector<8x128xf32> to vector<1x8x128xf32>
    %37 = arith.index_cast %c0_i32 : i32 to index
    %c0_14 = arith.constant 0 : index
    %c0_15 = arith.constant 0 : index
    %38 = vector.load %arg7[%37, %c0_14, %c0_15] : memref<16x8x128xf32, #tpu.memory_space<vmem>>, vector<1x8x128xf32>
    tpu.vector_store %arg7[%37, %c0_14, %c0_15], %36 {strides = array<i32>} : memref<16x8x128xf32, #tpu.memory_space<vmem>>, vector<1x8x128xf32>,
    %c1_i32 = arith.constant 1 : i32
    %39 = arith.index_cast %c1_i32 : i32 to index
    %c0_16 = arith.constant 0 : index
    %c0_17 = arith.constant 0 : index
    %40 = vector.load %arg7[%39, %c0_16, %c0_17] : memref<16x8x128xf32, #tpu.memory_space<vmem>>, vector<1x8x128xf32>
    %41 = vector.shape_cast %40 : vector<1x8x128xf32> to vector<8x128xf32>
    %42 = vector.extract_strided_slice %35 {offsets = [0, 0], sizes = [8, 1], strides = [1, 1]} : vector<8x128xf32> to vector<8x1xf32>
    %43 = vector.broadcast %42 : vector<8x1xf32> to vector<8x128xf32>
    %44 = arith.mulf %43, %12 : vector<8x128xf32>
    %45 = arith.addf %41, %44 : vector<8x128xf32>
    %46 = vector.extract_strided_slice %35 {offsets = [0, 1], sizes = [8, 1], strides = [1, 1]} : vector<8x128xf32> to vector<8x1xf32>
    %47 = vector.broadcast %46 : vector<8x1xf32> to vector<8x128xf32>
    %48 = arith.mulf %47, %15 : vector<8x128xf32>
    %49 = arith.addf %45, %48 : vector<8x128xf32>
    %50 = vector.extract_strided_slice %35 {offsets = [0, 2], sizes = [8, 1], strides = [1, 1]} : vector<8x128xf32> to vector<8x1xf32>
    %51 = vector.broadcast %50 : vector<8x1xf32> to vector<8x128xf32>
    %52 = arith.mulf %51, %18 : vector<8x128xf32>
    %53 = arith.addf %49, %52 : vector<8x128xf32>
    %54 = math.tanh %53 : vector<8x128xf32>
    %55 = vector.shape_cast %54 : vector<8x128xf32> to vector<1x8x128xf32>
    %56 = arith.index_cast %c1_i32 : i32 to index
    %c0_18 = arith.constant 0 : index
    %c0_19 = arith.constant 0 : index
    %57 = vector.load %arg7[%56, %c0_18, %c0_19] : memref<16x8x128xf32, #tpu.memory_space<vmem>>, vector<1x8x128xf32>
    tpu.vector_store %arg7[%56, %c0_18, %c0_19], %55 {strides = array<i32>} : memref<16x8x128xf32, #tpu.memory_space<vmem>>, vector<1x8x128xf32>,
    %c2_i32 = arith.constant 2 : i32
    %58 = arith.index_cast %c2_i32 : i32 to index
    %c0_20 = arith.constant 0 : index
    %c0_21 = arith.constant 0 : index
    %59 = vector.load %arg7[%58, %c0_20, %c0_21] : memref<16x8x128xf32, #tpu.memory_space<vmem>>, vector<1x8x128xf32>
    %60 = vector.shape_cast %59 : vector<1x8x128xf32> to vector<8x128xf32>
    %61 = vector.extract_strided_slice %54 {offsets = [0, 0], sizes = [8, 1], strides = [1, 1]} : vector<8x128xf32> to vector<8x1xf32>
    %62 = vector.broadcast %61 : vector<8x1xf32> to vector<8x128xf32>
    %63 = arith.mulf %62, %12 : vector<8x128xf32>
    %64 = arith.addf %60, %63 : vector<8x128xf32>
    %65 = vector.extract_strided_slice %54 {offsets = [0, 1], sizes = [8, 1], strides = [1, 1]} : vector<8x128xf32> to vector<8x1xf32>
    %66 = vector.broadcast %65 : vector<8x1xf32> to vector<8x128xf32>
    %67 = arith.mulf %66, %15 : vector<8x128xf32>
    %68 = arith.addf %64, %67 : vector<8x128xf32>
    %69 = vector.extract_strided_slice %54 {offsets = [0, 2], sizes = [8, 1], strides = [1, 1]} : vector<8x128xf32> to vector<8x1xf32>
    %70 = vector.broadcast %69 : vector<8x1xf32> to vector<8x128xf32>
    %71 = arith.mulf %70, %18 : vector<8x128xf32>
    %72 = arith.addf %68, %71 : vector<8x128xf32>
    %73 = math.tanh %72 : vector<8x128xf32>
    %74 = vector.shape_cast %73 : vector<8x128xf32> to vector<1x8x128xf32>
    %75 = arith.index_cast %c2_i32 : i32 to index
    %c0_22 = arith.constant 0 : index
    %c0_23 = arith.constant 0 : index
    %76 = vector.load %arg7[%75, %c0_22, %c0_23] : memref<16x8x128xf32, #tpu.memory_space<vmem>>, vector<1x8x128xf32>
    tpu.vector_store %arg7[%75, %c0_22, %c0_23], %74 {strides = array<i32>} : memref<16x8x128xf32, #tpu.memory_space<vmem>>, vector<1x8x128xf32>,
    %c3_i32 = arith.constant 3 : i32
    %77 = arith.index_cast %c3_i32 : i32 to index
    %c0_24 = arith.constant 0 : index
    %c0_25 = arith.constant 0 : index
    %78 = vector.load %arg7[%77, %c0_24, %c0_25] : memref<16x8x128xf32, #tpu.memory_space<vmem>>, vector<1x8x128xf32>
    %79 = vector.shape_cast %78 : vector<1x8x128xf32> to vector<8x128xf32>
    %80 = vector.extract_strided_slice %73 {offsets = [0, 0], sizes = [8, 1], strides = [1, 1]} : vector<8x128xf32> to vector<8x1xf32>
    %81 = vector.broadcast %80 : vector<8x1xf32> to vector<8x128xf32>
    %82 = arith.mulf %81, %12 : vector<8x128xf32>
    %83 = arith.addf %79, %82 : vector<8x128xf32>
    %84 = vector.extract_strided_slice %73 {offsets = [0, 1], sizes = [8, 1], strides = [1, 1]} : vector<8x128xf32> to vector<8x1xf32>
    %85 = vector.broadcast %84 : vector<8x1xf32> to vector<8x128xf32>
    %86 = arith.mulf %85, %15 : vector<8x128xf32>
    %87 = arith.addf %83, %86 : vector<8x128xf32>
    %88 = vector.extract_strided_slice %73 {offsets = [0, 2], sizes = [8, 1], strides = [1, 1]} : vector<8x128xf32> to vector<8x1xf32>
    %89 = vector.broadcast %88 : vector<8x1xf32> to vector<8x128xf32>
    %90 = arith.mulf %89, %18 : vector<8x128xf32>
    %91 = arith.addf %87, %90 : vector<8x128xf32>
    %92 = math.tanh %91 : vector<8x128xf32>
    %93 = vector.shape_cast %92 : vector<8x128xf32> to vector<1x8x128xf32>
    %94 = arith.index_cast %c3_i32 : i32 to index
    %c0_26 = arith.constant 0 : index
    %c0_27 = arith.constant 0 : index
    %95 = vector.load %arg7[%94, %c0_26, %c0_27] : memref<16x8x128xf32, #tpu.memory_space<vmem>>, vector<1x8x128xf32>
    tpu.vector_store %arg7[%94, %c0_26, %c0_27], %93 {strides = array<i32>} : memref<16x8x128xf32, #tpu.memory_space<vmem>>, vector<1x8x128xf32>,
    %c4_i32 = arith.constant 4 : i32
    %96 = arith.index_cast %c4_i32 : i32 to index
    %c0_28 = arith.constant 0 : index
    %c0_29 = arith.constant 0 : index
    %97 = vector.load %arg7[%96, %c0_28, %c0_29] : memref<16x8x128xf32, #tpu.memory_space<vmem>>, vector<1x8x128xf32>
    %98 = vector.shape_cast %97 : vector<1x8x128xf32> to vector<8x128xf32>
    %99 = vector.extract_strided_slice %92 {offsets = [0, 0], sizes = [8, 1], strides = [1, 1]} : vector<8x128xf32> to vector<8x1xf32>
    %100 = vector.broadcast %99 : vector<8x1xf32> to vector<8x128xf32>
    %101 = arith.mulf %100, %12 : vector<8x128xf32>
    %102 = arith.addf %98, %101 : vector<8x128xf32>
    %103 = vector.extract_strided_slice %92 {offsets = [0, 1], sizes = [8, 1], strides = [1, 1]} : vector<8x128xf32> to vector<8x1xf32>
    %104 = vector.broadcast %103 : vector<8x1xf32> to vector<8x128xf32>
    %105 = arith.mulf %104, %15 : vector<8x128xf32>
    %106 = arith.addf %102, %105 : vector<8x128xf32>
    %107 = vector.extract_strided_slice %92 {offsets = [0, 2], sizes = [8, 1], strides = [1, 1]} : vector<8x128xf32> to vector<8x1xf32>
    %108 = vector.broadcast %107 : vector<8x1xf32> to vector<8x128xf32>
    %109 = arith.mulf %108, %18 : vector<8x128xf32>
    %110 = arith.addf %106, %109 : vector<8x128xf32>
    %111 = math.tanh %110 : vector<8x128xf32>
    %112 = vector.shape_cast %111 : vector<8x128xf32> to vector<1x8x128xf32>
    %113 = arith.index_cast %c4_i32 : i32 to index
    %c0_30 = arith.constant 0 : index
    %c0_31 = arith.constant 0 : index
    %114 = vector.load %arg7[%113, %c0_30, %c0_31] : memref<16x8x128xf32, #tpu.memory_space<vmem>>, vector<1x8x128xf32>
    tpu.vector_store %arg7[%113, %c0_30, %c0_31], %112 {strides = array<i32>} : memref<16x8x128xf32, #tpu.memory_space<vmem>>, vector<1x8x128xf32>,
    %c5_i32 = arith.constant 5 : i32
    %115 = arith.index_cast %c5_i32 : i32 to index
    %c0_32 = arith.constant 0 : index
    %c0_33 = arith.constant 0 : index
    %116 = vector.load %arg7[%115, %c0_32, %c0_33] : memref<16x8x128xf32, #tpu.memory_space<vmem>>, vector<1x8x128xf32>
    %117 = vector.shape_cast %116 : vector<1x8x128xf32> to vector<8x128xf32>
    %118 = vector.extract_strided_slice %111 {offsets = [0, 0], sizes = [8, 1], strides = [1, 1]} : vector<8x128xf32> to vector<8x1xf32>
    %119 = vector.broadcast %118 : vector<8x1xf32> to vector<8x128xf32>
    %120 = arith.mulf %119, %12 : vector<8x128xf32>
    %121 = arith.addf %117, %120 : vector<8x128xf32>
    %122 = vector.extract_strided_slice %111 {offsets = [0, 1], sizes = [8, 1], strides = [1, 1]} : vector<8x128xf32> to vector<8x1xf32>
    %123 = vector.broadcast %122 : vector<8x1xf32> to vector<8x128xf32>
    %124 = arith.mulf %123, %15 : vector<8x128xf32>
    %125 = arith.addf %121, %124 : vector<8x128xf32>
    %126 = vector.extract_strided_slice %111 {offsets = [0, 2], sizes = [8, 1], strides = [1, 1]} : vector<8x128xf32> to vector<8x1xf32>
    %127 = vector.broadcast %126 : vector<8x1xf32> to vector<8x128xf32>
    %128 = arith.mulf %127, %18 : vector<8x128xf32>
    %129 = arith.addf %125, %128 : vector<8x128xf32>
    %130 = math.tanh %129 : vector<8x128xf32>
    %131 = vector.shape_cast %130 : vector<8x128xf32> to vector<1x8x128xf32>
    %132 = arith.index_cast %c5_i32 : i32 to index
    %c0_34 = arith.constant 0 : index
    %c0_35 = arith.constant 0 : index
    %133 = vector.load %arg7[%132, %c0_34, %c0_35] : memref<16x8x128xf32, #tpu.memory_space<vmem>>, vector<1x8x128xf32>
    tpu.vector_store %arg7[%132, %c0_34, %c0_35], %131 {strides = array<i32>} : memref<16x8x128xf32, #tpu.memory_space<vmem>>, vector<1x8x128xf32>,
    %c6_i32 = arith.constant 6 : i32
    %134 = arith.index_cast %c6_i32 : i32 to index
    %c0_36 = arith.constant 0 : index
    %c0_37 = arith.constant 0 : index
    %135 = vector.load %arg7[%134, %c0_36, %c0_37] : memref<16x8x128xf32, #tpu.memory_space<vmem>>, vector<1x8x128xf32>
    %136 = vector.shape_cast %135 : vector<1x8x128xf32> to vector<8x128xf32>
    %137 = vector.extract_strided_slice %130 {offsets = [0, 0], sizes = [8, 1], strides = [1, 1]} : vector<8x128xf32> to vector<8x1xf32>
    %138 = vector.broadcast %137 : vector<8x1xf32> to vector<8x128xf32>
    %139 = arith.mulf %138, %12 : vector<8x128xf32>
    %140 = arith.addf %136, %139 : vector<8x128xf32>
    %141 = vector.extract_strided_slice %130 {offsets = [0, 1], sizes = [8, 1], strides = [1, 1]} : vector<8x128xf32> to vector<8x1xf32>
    %142 = vector.broadcast %141 : vector<8x1xf32> to vector<8x128xf32>
    %143 = arith.mulf %142, %15 : vector<8x128xf32>
    %144 = arith.addf %140, %143 : vector<8x128xf32>
    %145 = vector.extract_strided_slice %130 {offsets = [0, 2], sizes = [8, 1], strides = [1, 1]} : vector<8x128xf32> to vector<8x1xf32>
    %146 = vector.broadcast %145 : vector<8x1xf32> to vector<8x128xf32>
    %147 = arith.mulf %146, %18 : vector<8x128xf32>
    %148 = arith.addf %144, %147 : vector<8x128xf32>
    %149 = math.tanh %148 : vector<8x128xf32>
    %150 = vector.shape_cast %149 : vector<8x128xf32> to vector<1x8x128xf32>
    %151 = arith.index_cast %c6_i32 : i32 to index
    %c0_38 = arith.constant 0 : index
    %c0_39 = arith.constant 0 : index
    %152 = vector.load %arg7[%151, %c0_38, %c0_39] : memref<16x8x128xf32, #tpu.memory_space<vmem>>, vector<1x8x128xf32>
    tpu.vector_store %arg7[%151, %c0_38, %c0_39], %150 {strides = array<i32>} : memref<16x8x128xf32, #tpu.memory_space<vmem>>, vector<1x8x128xf32>,
    %c7_i32 = arith.constant 7 : i32
    %153 = arith.index_cast %c7_i32 : i32 to index
    %c0_40 = arith.constant 0 : index
    %c0_41 = arith.constant 0 : index
    %154 = vector.load %arg7[%153, %c0_40, %c0_41] : memref<16x8x128xf32, #tpu.memory_space<vmem>>, vector<1x8x128xf32>
    %155 = vector.shape_cast %154 : vector<1x8x128xf32> to vector<8x128xf32>
    %156 = vector.extract_strided_slice %149 {offsets = [0, 0], sizes = [8, 1], strides = [1, 1]} : vector<8x128xf32> to vector<8x1xf32>
    %157 = vector.broadcast %156 : vector<8x1xf32> to vector<8x128xf32>
    %158 = arith.mulf %157, %12 : vector<8x128xf32>
    %159 = arith.addf %155, %158 : vector<8x128xf32>
    %160 = vector.extract_strided_slice %149 {offsets = [0, 1], sizes = [8, 1], strides = [1, 1]} : vector<8x128xf32> to vector<8x1xf32>
    %161 = vector.broadcast %160 : vector<8x1xf32> to vector<8x128xf32>
    %162 = arith.mulf %161, %15 : vector<8x128xf32>
    %163 = arith.addf %159, %162 : vector<8x128xf32>
    %164 = vector.extract_strided_slice %149 {offsets = [0, 2], sizes = [8, 1], strides = [1, 1]} : vector<8x128xf32> to vector<8x1xf32>
    %165 = vector.broadcast %164 : vector<8x1xf32> to vector<8x128xf32>
    %166 = arith.mulf %165, %18 : vector<8x128xf32>
    %167 = arith.addf %163, %166 : vector<8x128xf32>
    %168 = math.tanh %167 : vector<8x128xf32>
    %169 = vector.shape_cast %168 : vector<8x128xf32> to vector<1x8x128xf32>
    %170 = arith.index_cast %c7_i32 : i32 to index
    %c0_42 = arith.constant 0 : index
    %c0_43 = arith.constant 0 : index
    %171 = vector.load %arg7[%170, %c0_42, %c0_43] : memref<16x8x128xf32, #tpu.memory_space<vmem>>, vector<1x8x128xf32>
    tpu.vector_store %arg7[%170, %c0_42, %c0_43], %169 {strides = array<i32>} : memref<16x8x128xf32, #tpu.memory_space<vmem>>, vector<1x8x128xf32>,
    %c8_i32 = arith.constant 8 : i32
    %172 = arith.index_cast %c8_i32 : i32 to index
    %c0_44 = arith.constant 0 : index
    %c0_45 = arith.constant 0 : index
    %173 = vector.load %arg7[%172, %c0_44, %c0_45] : memref<16x8x128xf32, #tpu.memory_space<vmem>>, vector<1x8x128xf32>
    %174 = vector.shape_cast %173 : vector<1x8x128xf32> to vector<8x128xf32>
    %175 = vector.extract_strided_slice %168 {offsets = [0, 0], sizes = [8, 1], strides = [1, 1]} : vector<8x128xf32> to vector<8x1xf32>
    %176 = vector.broadcast %175 : vector<8x1xf32> to vector<8x128xf32>
    %177 = arith.mulf %176, %12 : vector<8x128xf32>
    %178 = arith.addf %174, %177 : vector<8x128xf32>
    %179 = vector.extract_strided_slice %168 {offsets = [0, 1], sizes = [8, 1], strides = [1, 1]} : vector<8x128xf32> to vector<8x1xf32>
    %180 = vector.broadcast %179 : vector<8x1xf32> to vector<8x128xf32>
    %181 = arith.mulf %180, %15 : vector<8x128xf32>
    %182 = arith.addf %178, %181 : vector<8x128xf32>
    %183 = vector.extract_strided_slice %168 {offsets = [0, 2], sizes = [8, 1], strides = [1, 1]} : vector<8x128xf32> to vector<8x1xf32>
    %184 = vector.broadcast %183 : vector<8x1xf32> to vector<8x128xf32>
    %185 = arith.mulf %184, %18 : vector<8x128xf32>
    %186 = arith.addf %182, %185 : vector<8x128xf32>
    %187 = math.tanh %186 : vector<8x128xf32>
    %188 = vector.shape_cast %187 : vector<8x128xf32> to vector<1x8x128xf32>
    %189 = arith.index_cast %c8_i32 : i32 to index
    %c0_46 = arith.constant 0 : index
    %c0_47 = arith.constant 0 : index
    %190 = vector.load %arg7[%189, %c0_46, %c0_47] : memref<16x8x128xf32, #tpu.memory_space<vmem>>, vector<1x8x128xf32>
    tpu.vector_store %arg7[%189, %c0_46, %c0_47], %188 {strides = array<i32>} : memref<16x8x128xf32, #tpu.memory_space<vmem>>, vector<1x8x128xf32>,
    %c9_i32 = arith.constant 9 : i32
    %191 = arith.index_cast %c9_i32 : i32 to index
    %c0_48 = arith.constant 0 : index
    %c0_49 = arith.constant 0 : index
    %192 = vector.load %arg7[%191, %c0_48, %c0_49] : memref<16x8x128xf32, #tpu.memory_space<vmem>>, vector<1x8x128xf32>
    %193 = vector.shape_cast %192 : vector<1x8x128xf32> to vector<8x128xf32>
    %194 = vector.extract_strided_slice %187 {offsets = [0, 0], sizes = [8, 1], strides = [1, 1]} : vector<8x128xf32> to vector<8x1xf32>
    %195 = vector.broadcast %194 : vector<8x1xf32> to vector<8x128xf32>
    %196 = arith.mulf %195, %12 : vector<8x128xf32>
    %197 = arith.addf %193, %196 : vector<8x128xf32>
    %198 = vector.extract_strided_slice %187 {offsets = [0, 1], sizes = [8, 1], strides = [1, 1]} : vector<8x128xf32> to vector<8x1xf32>
    %199 = vector.broadcast %198 : vector<8x1xf32> to vector<8x128xf32>
    %200 = arith.mulf %199, %15 : vector<8x128xf32>
    %201 = arith.addf %197, %200 : vector<8x128xf32>
    %202 = vector.extract_strided_slice %187 {offsets = [0, 2], sizes = [8, 1], strides = [1, 1]} : vector<8x128xf32> to vector<8x1xf32>
    %203 = vector.broadcast %202 : vector<8x1xf32> to vector<8x128xf32>
    %204 = arith.mulf %203, %18 : vector<8x128xf32>
    %205 = arith.addf %201, %204 : vector<8x128xf32>
    %206 = math.tanh %205 : vector<8x128xf32>
    %207 = vector.shape_cast %206 : vector<8x128xf32> to vector<1x8x128xf32>
    %208 = arith.index_cast %c9_i32 : i32 to index
    %c0_50 = arith.constant 0 : index
    %c0_51 = arith.constant 0 : index
    %209 = vector.load %arg7[%208, %c0_50, %c0_51] : memref<16x8x128xf32, #tpu.memory_space<vmem>>, vector<1x8x128xf32>
    tpu.vector_store %arg7[%208, %c0_50, %c0_51], %207 {strides = array<i32>} : memref<16x8x128xf32, #tpu.memory_space<vmem>>, vector<1x8x128xf32>,
    %c10_i32 = arith.constant 10 : i32
    %210 = arith.index_cast %c10_i32 : i32 to index
    %c0_52 = arith.constant 0 : index
    %c0_53 = arith.constant 0 : index
    %211 = vector.load %arg7[%210, %c0_52, %c0_53] : memref<16x8x128xf32, #tpu.memory_space<vmem>>, vector<1x8x128xf32>
    %212 = vector.shape_cast %211 : vector<1x8x128xf32> to vector<8x128xf32>
    %213 = vector.extract_strided_slice %206 {offsets = [0, 0], sizes = [8, 1], strides = [1, 1]} : vector<8x128xf32> to vector<8x1xf32>
    %214 = vector.broadcast %213 : vector<8x1xf32> to vector<8x128xf32>
    %215 = arith.mulf %214, %12 : vector<8x128xf32>
    %216 = arith.addf %212, %215 : vector<8x128xf32>
    %217 = vector.extract_strided_slice %206 {offsets = [0, 1], sizes = [8, 1], strides = [1, 1]} : vector<8x128xf32> to vector<8x1xf32>
    %218 = vector.broadcast %217 : vector<8x1xf32> to vector<8x128xf32>
    %219 = arith.mulf %218, %15 : vector<8x128xf32>
    %220 = arith.addf %216, %219 : vector<8x128xf32>
    %221 = vector.extract_strided_slice %206 {offsets = [0, 2], sizes = [8, 1], strides = [1, 1]} : vector<8x128xf32> to vector<8x1xf32>
    %222 = vector.broadcast %221 : vector<8x1xf32> to vector<8x128xf32>
    %223 = arith.mulf %222, %18 : vector<8x128xf32>
    %224 = arith.addf %220, %223 : vector<8x128xf32>
    %225 = math.tanh %224 : vector<8x128xf32>
    %226 = vector.shape_cast %225 : vector<8x128xf32> to vector<1x8x128xf32>
    %227 = arith.index_cast %c10_i32 : i32 to index
    %c0_54 = arith.constant 0 : index
    %c0_55 = arith.constant 0 : index
    %228 = vector.load %arg7[%227, %c0_54, %c0_55] : memref<16x8x128xf32, #tpu.memory_space<vmem>>, vector<1x8x128xf32>
    tpu.vector_store %arg7[%227, %c0_54, %c0_55], %226 {strides = array<i32>} : memref<16x8x128xf32, #tpu.memory_space<vmem>>, vector<1x8x128xf32>,
    %c11_i32 = arith.constant 11 : i32
    %229 = arith.index_cast %c11_i32 : i32 to index
    %c0_56 = arith.constant 0 : index
    %c0_57 = arith.constant 0 : index
    %230 = vector.load %arg7[%229, %c0_56, %c0_57] : memref<16x8x128xf32, #tpu.memory_space<vmem>>, vector<1x8x128xf32>
    %231 = vector.shape_cast %230 : vector<1x8x128xf32> to vector<8x128xf32>
    %232 = vector.extract_strided_slice %225 {offsets = [0, 0], sizes = [8, 1], strides = [1, 1]} : vector<8x128xf32> to vector<8x1xf32>
    %233 = vector.broadcast %232 : vector<8x1xf32> to vector<8x128xf32>
    %234 = arith.mulf %233, %12 : vector<8x128xf32>
    %235 = arith.addf %231, %234 : vector<8x128xf32>
    %236 = vector.extract_strided_slice %225 {offsets = [0, 1], sizes = [8, 1], strides = [1, 1]} : vector<8x128xf32> to vector<8x1xf32>
    %237 = vector.broadcast %236 : vector<8x1xf32> to vector<8x128xf32>
    %238 = arith.mulf %237, %15 : vector<8x128xf32>
    %239 = arith.addf %235, %238 : vector<8x128xf32>
    %240 = vector.extract_strided_slice %225 {offsets = [0, 2], sizes = [8, 1], strides = [1, 1]} : vector<8x128xf32> to vector<8x1xf32>
    %241 = vector.broadcast %240 : vector<8x1xf32> to vector<8x128xf32>
    %242 = arith.mulf %241, %18 : vector<8x128xf32>
    %243 = arith.addf %239, %242 : vector<8x128xf32>
    %244 = math.tanh %243 : vector<8x128xf32>
    %245 = vector.shape_cast %244 : vector<8x128xf32> to vector<1x8x128xf32>
    %246 = arith.index_cast %c11_i32 : i32 to index
    %c0_58 = arith.constant 0 : index
    %c0_59 = arith.constant 0 : index
    %247 = vector.load %arg7[%246, %c0_58, %c0_59] : memref<16x8x128xf32, #tpu.memory_space<vmem>>, vector<1x8x128xf32>
    tpu.vector_store %arg7[%246, %c0_58, %c0_59], %245 {strides = array<i32>} : memref<16x8x128xf32, #tpu.memory_space<vmem>>, vector<1x8x128xf32>,
    %c12_i32 = arith.constant 12 : i32
    %248 = arith.index_cast %c12_i32 : i32 to index
    %c0_60 = arith.constant 0 : index
    %c0_61 = arith.constant 0 : index
    %249 = vector.load %arg7[%248, %c0_60, %c0_61] : memref<16x8x128xf32, #tpu.memory_space<vmem>>, vector<1x8x128xf32>
    %250 = vector.shape_cast %249 : vector<1x8x128xf32> to vector<8x128xf32>
    %251 = vector.extract_strided_slice %244 {offsets = [0, 0], sizes = [8, 1], strides = [1, 1]} : vector<8x128xf32> to vector<8x1xf32>
    %252 = vector.broadcast %251 : vector<8x1xf32> to vector<8x128xf32>
    %253 = arith.mulf %252, %12 : vector<8x128xf32>
    %254 = arith.addf %250, %253 : vector<8x128xf32>
    %255 = vector.extract_strided_slice %244 {offsets = [0, 1], sizes = [8, 1], strides = [1, 1]} : vector<8x128xf32> to vector<8x1xf32>
    %256 = vector.broadcast %255 : vector<8x1xf32> to vector<8x128xf32>
    %257 = arith.mulf %256, %15 : vector<8x128xf32>
    %258 = arith.addf %254, %257 : vector<8x128xf32>
    %259 = vector.extract_strided_slice %244 {offsets = [0, 2], sizes = [8, 1], strides = [1, 1]} : vector<8x128xf32> to vector<8x1xf32>
    %260 = vector.broadcast %259 : vector<8x1xf32> to vector<8x128xf32>
    %261 = arith.mulf %260, %18 : vector<8x128xf32>
    %262 = arith.addf %258, %261 : vector<8x128xf32>
    %263 = math.tanh %262 : vector<8x128xf32>
    %264 = vector.shape_cast %263 : vector<8x128xf32> to vector<1x8x128xf32>
    %265 = arith.index_cast %c12_i32 : i32 to index
    %c0_62 = arith.constant 0 : index
    %c0_63 = arith.constant 0 : index
    %266 = vector.load %arg7[%265, %c0_62, %c0_63] : memref<16x8x128xf32, #tpu.memory_space<vmem>>, vector<1x8x128xf32>
    tpu.vector_store %arg7[%265, %c0_62, %c0_63], %264 {strides = array<i32>} : memref<16x8x128xf32, #tpu.memory_space<vmem>>, vector<1x8x128xf32>,
    %c13_i32 = arith.constant 13 : i32
    %267 = arith.index_cast %c13_i32 : i32 to index
    %c0_64 = arith.constant 0 : index
    %c0_65 = arith.constant 0 : index
    %268 = vector.load %arg7[%267, %c0_64, %c0_65] : memref<16x8x128xf32, #tpu.memory_space<vmem>>, vector<1x8x128xf32>
    %269 = vector.shape_cast %268 : vector<1x8x128xf32> to vector<8x128xf32>
    %270 = vector.extract_strided_slice %263 {offsets = [0, 0], sizes = [8, 1], strides = [1, 1]} : vector<8x128xf32> to vector<8x1xf32>
    %271 = vector.broadcast %270 : vector<8x1xf32> to vector<8x128xf32>
    %272 = arith.mulf %271, %12 : vector<8x128xf32>
    %273 = arith.addf %269, %272 : vector<8x128xf32>
    %274 = vector.extract_strided_slice %263 {offsets = [0, 1], sizes = [8, 1], strides = [1, 1]} : vector<8x128xf32> to vector<8x1xf32>
    %275 = vector.broadcast %274 : vector<8x1xf32> to vector<8x128xf32>
    %276 = arith.mulf %275, %15 : vector<8x128xf32>
    %277 = arith.addf %273, %276 : vector<8x128xf32>
    %278 = vector.extract_strided_slice %263 {offsets = [0, 2], sizes = [8, 1], strides = [1, 1]} : vector<8x128xf32> to vector<8x1xf32>
    %279 = vector.broadcast %278 : vector<8x1xf32> to vector<8x128xf32>
    %280 = arith.mulf %279, %18 : vector<8x128xf32>
    %281 = arith.addf %277, %280 : vector<8x128xf32>
    %282 = math.tanh %281 : vector<8x128xf32>
    %283 = vector.shape_cast %282 : vector<8x128xf32> to vector<1x8x128xf32>
    %284 = arith.index_cast %c13_i32 : i32 to index
    %c0_66 = arith.constant 0 : index
    %c0_67 = arith.constant 0 : index
    %285 = vector.load %arg7[%284, %c0_66, %c0_67] : memref<16x8x128xf32, #tpu.memory_space<vmem>>, vector<1x8x128xf32>
    tpu.vector_store %arg7[%284, %c0_66, %c0_67], %283 {strides = array<i32>} : memref<16x8x128xf32, #tpu.memory_space<vmem>>, vector<1x8x128xf32>,
    %c14_i32 = arith.constant 14 : i32
    %286 = arith.index_cast %c14_i32 : i32 to index
    %c0_68 = arith.constant 0 : index
    %c0_69 = arith.constant 0 : index
    %287 = vector.load %arg7[%286, %c0_68, %c0_69] : memref<16x8x128xf32, #tpu.memory_space<vmem>>, vector<1x8x128xf32>
    %288 = vector.shape_cast %287 : vector<1x8x128xf32> to vector<8x128xf32>
    %289 = vector.extract_strided_slice %282 {offsets = [0, 0], sizes = [8, 1], strides = [1, 1]} : vector<8x128xf32> to vector<8x1xf32>
    %290 = vector.broadcast %289 : vector<8x1xf32> to vector<8x128xf32>
    %291 = arith.mulf %290, %12 : vector<8x128xf32>
    %292 = arith.addf %288, %291 : vector<8x128xf32>
    %293 = vector.extract_strided_slice %282 {offsets = [0, 1], sizes = [8, 1], strides = [1, 1]} : vector<8x128xf32> to vector<8x1xf32>
    %294 = vector.broadcast %293 : vector<8x1xf32> to vector<8x128xf32>
    %295 = arith.mulf %294, %15 : vector<8x128xf32>
    %296 = arith.addf %292, %295 : vector<8x128xf32>
    %297 = vector.extract_strided_slice %282 {offsets = [0, 2], sizes = [8, 1], strides = [1, 1]} : vector<8x128xf32> to vector<8x1xf32>
    %298 = vector.broadcast %297 : vector<8x1xf32> to vector<8x128xf32>
    %299 = arith.mulf %298, %18 : vector<8x128xf32>
    %300 = arith.addf %296, %299 : vector<8x128xf32>
    %301 = math.tanh %300 : vector<8x128xf32>
    %302 = vector.shape_cast %301 : vector<8x128xf32> to vector<1x8x128xf32>
    %303 = arith.index_cast %c14_i32 : i32 to index
    %c0_70 = arith.constant 0 : index
    %c0_71 = arith.constant 0 : index
    %304 = vector.load %arg7[%303, %c0_70, %c0_71] : memref<16x8x128xf32, #tpu.memory_space<vmem>>, vector<1x8x128xf32>
    tpu.vector_store %arg7[%303, %c0_70, %c0_71], %302 {strides = array<i32>} : memref<16x8x128xf32, #tpu.memory_space<vmem>>, vector<1x8x128xf32>,
    %c15_i32 = arith.constant 15 : i32
    %305 = arith.index_cast %c15_i32 : i32 to index
    %c0_72 = arith.constant 0 : index
    %c0_73 = arith.constant 0 : index
    %306 = vector.load %arg7[%305, %c0_72, %c0_73] : memref<16x8x128xf32, #tpu.memory_space<vmem>>, vector<1x8x128xf32>
    %307 = vector.shape_cast %306 : vector<1x8x128xf32> to vector<8x128xf32>
    %308 = vector.extract_strided_slice %301 {offsets = [0, 0], sizes = [8, 1], strides = [1, 1]} : vector<8x128xf32> to vector<8x1xf32>
    %309 = vector.broadcast %308 : vector<8x1xf32> to vector<8x128xf32>
    %310 = arith.mulf %309, %12 : vector<8x128xf32>
    %311 = arith.addf %307, %310 : vector<8x128xf32>
    %312 = vector.extract_strided_slice %301 {offsets = [0, 1], sizes = [8, 1], strides = [1, 1]} : vector<8x128xf32> to vector<8x1xf32>
    %313 = vector.broadcast %312 : vector<8x1xf32> to vector<8x128xf32>
    %314 = arith.mulf %313, %15 : vector<8x128xf32>
    %315 = arith.addf %311, %314 : vector<8x128xf32>
    %316 = vector.extract_strided_slice %301 {offsets = [0, 2], sizes = [8, 1], strides = [1, 1]} : vector<8x128xf32> to vector<8x1xf32>
    %317 = vector.broadcast %316 : vector<8x1xf32> to vector<8x128xf32>
    %318 = arith.mulf %317, %18 : vector<8x128xf32>
    %319 = arith.addf %315, %318 : vector<8x128xf32>
    %320 = math.tanh %319 : vector<8x128xf32>
    %321 = vector.shape_cast %320 : vector<8x128xf32> to vector<1x8x128xf32>
    %322 = arith.index_cast %c15_i32 : i32 to index
    %c0_74 = arith.constant 0 : index
    %c0_75 = arith.constant 0 : index
    %323 = vector.load %arg7[%322, %c0_74, %c0_75] : memref<16x8x128xf32, #tpu.memory_space<vmem>>, vector<1x8x128xf32>
    tpu.vector_store %arg7[%322, %c0_74, %c0_75], %321 {strides = array<i32>} : memref<16x8x128xf32, #tpu.memory_space<vmem>>, vector<1x8x128xf32>,
    %c16_i32 = arith.constant 16 : i32
    %c6 = arith.constant 6 : index
    %c0_76 = arith.constant 0 : index
    %c0_77 = arith.constant 0 : index
    %324 = vector.load %arg7[%c6, %c0_76, %c0_77] : memref<16x8x128xf32, #tpu.memory_space<vmem>>, vector<10x8x128xf32>
    %325 = vector.shape_cast %324 : vector<10x8x128xf32> to vector<80x128xf32>
    %c0_78 = arith.constant 0 : index
    %c0_79 = arith.constant 0 : index
    %326 = vector.load %arg4[%c0_78, %c0_79] : memref<128x128xf32, #tpu.memory_space<vmem>>, vector<128x128xf32>
    %cst_80 = arith.constant dense<0.000000e+00> : vector<80x128xf32>
    %327 = tpu.matmul %325, %326, %cst_80 {dimension_numbers = #tpu.dot_dimension_numbers<[1], [0], [0], [1], [0, 0, 1, 1], [], []>} : vector<80x128xf32>, vector<128x128xf32>, vector<80x128xf32> -> vector<80x128xf32>
    %c0_81 = arith.constant 0 : index
    %c0_82 = arith.constant 0 : index
    %328 = vector.load %arg5[%c0_81, %c0_82] : memref<1x128xf32, #tpu.memory_space<vmem>>, vector<1x128xf32>
    %329 = vector.broadcast %328 : vector<1x128xf32> to vector<80x128xf32>
    %330 = arith.addf %327, %329 : vector<80x128xf32>
    %331 = vector.shape_cast %330 : vector<80x128xf32> to vector<10x8x128xf32>
    %c0_83 = arith.constant 0 : index
    %c0_84 = arith.constant 0 : index
    %c0_85 = arith.constant 0 : index
    %332 = vector.load %arg6[%c0_83, %c0_84, %c0_85] : memref<10x8x128xf32, #tpu.memory_space<vmem>>, vector<10x8x128xf32>
    tpu.vector_store %arg6[%c0_83, %c0_84, %c0_85], %331 {strides = array<i32>} : memref<10x8x128xf32, #tpu.memory_space<vmem>>, vector<10x8x128xf32>,
    return
  }
}

</mosaic_0001>

<bundles_post_ra>
// kernel: forward.1
= control target key start
LH: loop header
LB: loop body
LE: loop exit
PB: predicated region body
PF: predicated region fallthrough
CT: control target
= control target key end

     0   :  { %11 = vsyncpa [#allocation4], 0  ;;  %s1072_s0 = inlined_call_operand.vmem [shape: f32[16,8,128], index: 0, kind: input, shape index: {}]   ;;  %s1073_s1 = inlined_call_operand.hbm [shape: f32[128,128], index: 1, kind: input, shape index: {}]   ;;  %s1074_s2 = inlined_call_operand.hbm [shape: f32[128,128], index: 2, kind: input, shape index: {}]   ;;  %s1075_s3 = inlined_call_operand.vmem [shape: f32[1,128], index: 3, kind: input, shape index: {}]   ;;  %s1076_s4 = inlined_call_operand.vmem [shape: f32[128,128], index: 4, kind: input, shape index: {}]   ;;  %s1077_s5 = inlined_call_operand.vmem [shape: f32[1,128], index: 5, kind: input, shape index: {}]   ;;  %s1078_s6 = inlined_call_operand.vmem [shape: f32[10,8,128], index: 6, kind: output, shape index: {}]  }
   0x1   :  { %s19_s23 = sshll.u32 %s1073_s1, 4  ;;  %s20_s23 = int_to_ptr.hbm [resolvable:$true] %s19_s23 }
   0x2   :  { %12 = vsyncpa [#allocation6], 0  ;;  %s778_s24 = smov [#allocation3]   ;;  %s32_s28 = sshll.u32 %s1074_s2, 4  ;;  %s33_s28 = int_to_ptr.hbm [resolvable:$true] %s32_s28 }
   0x3   :  { %s21_s25 = sshll.u32 %s778_s24, 4  ;;  %s779_s29 = smov 128   ;;  %s22_s25 = int_to_ptr.vmem [resolvable:$true] %s21_s25 }
   0x4   :  { %s780_s30 = smov 8   ;;  %s781_s7 = smov [#allocation5]  }
   0x5   :  { %27 = dma.hbm_to_vmem [thread:$0]  %s20_s23, 2048, %s22_s25, [#allocation4], %s779_s29, %s779_s29, %s780_s30  }
   0x6   :  { %s34_s8 = sshll.u32 %s781_s7, 4  ;;  %s35_s8 = int_to_ptr.vmem [resolvable:$true] %s34_s8 }
   0x7   :  { %40 = dma.hbm_to_vmem [thread:$0]  %s33_s28, 2048, %s35_s8, [#allocation6], %s779_s29, %s779_s29, %s780_s30  }
   0x8   :  { %774 = dma.done.wait [#allocation4], 2048  }
   0x9   :  { %775 = vsyncadd [#allocation4], 4294965248 }
   0xa   :  { %776 = dma.done.wait [#allocation6], 2048  }
   0xb   :  { %777 = vsyncadd [#allocation6], 4294965248  ;;  %v86_v0 = vld [vmem:[#allocation3 + $0x78] sm:$0xff]  ;;  %v85_v1 = vld [vmem:[#allocation3 + $0x70] sm:$0xff]  ;;  %v782_v18 = vmov 2   ;;  %v783_v19 = vmov 0  }
   0xc   :  { %91 = vmatpush.msra.mxu0 %v86_v0  ;;  %623 = vmatpush.msra.mxu2 %v86_v0  ;;  %v84_v2 = vld [vmem:[#allocation3 + $0x68] sm:$0xff]  ;;  %v83_v3 = vld [vmem:[#allocation3 + $0x60] sm:$0xff]  ;;  %v82_v4 = vld [vmem:[#allocation3 + $0x58] sm:$0xff]  ;;  %v784_v20 = vmov 1  }
   0xd   :  { %v81_v5 = vld [vmem:[#allocation3 + $0x50] sm:$0xff]  ;;  %v80_v6 = vld [vmem:[#allocation3 + $0x48] sm:$0xff]  ;;  %v79_v7 = vld [vmem:[#allocation3 + $0x40] sm:$0xff]  ;;  %664 = vset.pattern.permute.xlu1 %v782_v18  ;;  %662 = vset.pattern.permute.xlu0 %v783_v19 }
   0xe   :  { %92 = vmatpush.msra.mxu0 %v85_v1  ;;  %624 = vmatpush.msra.mxu2 %v85_v1  ;;  %v78_v8 = vld [vmem:[#allocation3 + $0x38] sm:$0xff]  ;;  %v77_v9 = vld [vmem:[#allocation3 + $0x30] sm:$0xff]  ;;  %v76_v10 = vld [vmem:[#allocation3 + $0x28] sm:$0xff] }
   0xf   :  { %v75_v11 = vld [vmem:[#allocation3 + $0x20] sm:$0xff]  ;;  %v74_v12 = vld [vmem:[#allocation3 + $0x18] sm:$0xff]  ;;  %v73_v13 = vld [vmem:[#allocation3 + $0x10] sm:$0xff]  ;;  %666 = vset.pattern.permute.xlu2 %v784_v20 }
  0x10   :  { %93 = vmatpush.msra.mxu0 %v84_v2  ;;  %625 = vmatpush.msra.mxu2 %v84_v2  ;;  %v72_v14 = vld [vmem:[#allocation3 + $0x8] sm:$0xff]  ;;  %v71_v15 = vld [vmem:[#allocation3] sm:$0xff]  ;;  %v57_v35 = vld [vmem:[%s1072_s0 + $0x10] sm:$0xff] }
  0x11   :  { %v55_v16 = vld [vmem:[%s1072_s0] sm:$0xff]  ;;  %v56_v17 = vld [vmem:[%s1072_s0 + $0x8] sm:$0xff]  ;;  %v58_v48 = vld [vmem:[%s1072_s0 + $0x18] sm:$0xff] }
  0x12   :  { %94 = vmatpush.msra.mxu0 %v83_v3  ;;  %626 = vmatpush.msra.mxu2 %v83_v3  ;;  %v172_v21 = vld [vmem:[#allocation5] sm:$0xff] }
  0x13   :  { %v835_v22 = vperm.slane %v172_v21, 0  ;;  %v840_v23 = vld [vmem:[%s1075_s3] ss:$0 sm:$0xff]  ;;  %v842_v24 = vperm.slane %v172_v21, 1  ;;  %v844_v25 = vperm.slane %v172_v21, 2 }
  0x14   :  { %95 = vmatpush.msra.mxu0 %v82_v4  ;;  %627 = vmatpush.msra.mxu2 %v82_v4  ;;  %v59_v61 = vld [vmem:[%s1072_s0 + $0x20] sm:$0xff] }
  0x15   :  { %v177_v26 = vmul.f32 0.0, %v835_v22  ;;  %v179_v29 = vmul.f32 0.0, %v842_v24  ;;  %v181_v31 = vmul.f32 0.0, %v844_v25 }
  0x16   :  { %96 = vmatpush.msra.mxu0 %v81_v5  ;;  %628 = vmatpush.msra.mxu2 %v81_v5 }
  0x18   :  { %97 = vmatpush.msra.mxu0 %v80_v6  ;;  %629 = vmatpush.msra.mxu2 %v80_v6 }
  0x1a   :  { %98 = vmatpush.msra.mxu0 %v79_v7  ;;  %630 = vmatpush.msra.mxu2 %v79_v7 }
  0x1c   :  { %99 = vmatpush.msra.mxu0 %v78_v8  ;;  %631 = vmatpush.msra.mxu2 %v78_v8 }
  0x1e   :  { %100 = vmatpush.msra.mxu0 %v77_v9  ;;  %632 = vmatpush.msra.mxu2 %v77_v9 }
  0x20   :  { %101 = vmatpush.msra.mxu0 %v76_v10  ;;  %633 = vmatpush.msra.mxu2 %v76_v10  ;;  %v60_v10 = vld [vmem:[%s1072_s0 + $0x28] sm:$0xff] }
  0x22   :  { %102 = vmatpush.msra.mxu0 %v75_v11  ;;  %634 = vmatpush.msra.mxu2 %v75_v11  ;;  %v61_v11 = vld [vmem:[%s1072_s0 + $0x30] sm:$0xff] }
  0x24   :  { %103 = vmatpush.msra.mxu0 %v74_v12  ;;  %635 = vmatpush.msra.mxu2 %v74_v12 }
  0x26   :  { %104 = vmatpush.msra.mxu0 %v73_v13  ;;  %636 = vmatpush.msra.mxu2 %v73_v13 }
  0x28   :  { %105 = vmatpush.msra.mxu0 %v72_v14  ;;  %637 = vmatpush.msra.mxu2 %v72_v14 }
  0x2a   :  { %106 = vmatpush.msra.mxu0 %v71_v15  ;;  %638 = vmatpush.msra.mxu2 %v71_v15 }
  0x2b   :  { %107 = vmatmul.f32.vlgmr.msra.gmra.mxu0 %v55_v16  ;;  %125 = vmatmul.f32.vlgmr.msra.gmra.mxu2 %v61_v11 }
  0x33   :  { %110 = vmatmul.f32.gmra.mxu0 %v56_v17 }
  0x3b   :  { %113 = vmatmul.f32.gmra.mxu0 %v57_v35 }
  0x43   :  { %116 = vmatmul.f32.gmra.mxu0 %v58_v48  ;;  %v551_v48 = vld [vmem:[%s1076_s4 + $0x58] sm:$0xff] }
  0x4b   :  { %119 = vmatmul.f32.gmra.mxu0 %v59_v61 }
  0x53   :  { %122 = vmatmul.f32.gmra.mxu0 %v60_v10 }
  0xa8   :  { %v108_v27 = vpop.f32.mrf.mxu0 }
  0xa9   :  { %v109_v28 = vadd.f32 %v840_v23, %v108_v27 }
  0xab   :  { %v178_v30 = vadd.f32 %v177_v26, %v109_v28 }
  0xad   :  { %v180_v32 = vadd.f32 %v179_v29, %v178_v30 }
  0xae   :  { %v126_v61 = vpop.f32.mrf.mxu2 }
  0xaf   :  { %v182_v33 = vadd.f32 %v181_v31, %v180_v32 }
  0xb0   :  { %v111_v37 = vpop.f32.mrf.mxu0 }
  0xb1   :  { %694 = vtanh.f32 %v182_v33  ;;  %v112_v38 = vadd.f32 %v840_v23, %v111_v37 }
  0xb7   :  { %v695_v34 = vpop.eup %694 }
  0xb8   :  { %201 = vperm.xlu1 %664, %v695_v34   ;;  %189 = vperm.xlu0 %662, %v695_v34   ;;  %v114_v50 = vpop.f32.mrf.mxu0 }
  0xb9   :  { %v115_v51 = vadd.f32 %v840_v23, %v114_v50  ;;  %v549_v50 = vld [vmem:[%s1076_s4 + $0x48] sm:$0xff] }
  0xc0   :  { %663 = vset.pattern.permute.xlu0 %v784_v20  ;;  %665 = vset.pattern.permute.xlu1 %v783_v19  ;;  %v117_v62 = vpop.f32.mrf.mxu0 }
  0xc1   :  { %195 = vperm.xlu0 %663, %v695_v34   ;;  %v118_v63 = vadd.f32 %v840_v23, %v117_v62  ;;  %v127_v62 = vadd.f32 %v840_v23, %v126_v61 }
  0xc8   :  { %v120_v12 = vpop.f32.mrf.mxu0 }
  0xc9   :  { %669 = vset.pattern.permute.xlu0 %v782_v18  ;;  %v121_v14 = vadd.f32 %v840_v23, %v120_v12 }
  0xd0   :  { %v123_v31 = vpop.f32.mrf.mxu0 }
  0xd1   :  { %v124_v33 = vadd.f32 %v840_v23, %v123_v31  ;;  %v64_v31 = vld [vmem:[%s1072_s0 + $0x48] sm:$0xff] }
 0x12a   :  { %v190_v36 = vpop.permute.xlu0 %189  ;;  %v202_v40 = vpop.permute.xlu1 %201 }
 0x12b   :  { %v192_v39 = vmul.f32 %v190_v36, %v835_v22  ;;  %v204_v44 = vmul.f32 %v202_v40, %v844_v25 }
 0x12d   :  { %v193_v42 = vadd.f32 %v192_v39, %v112_v38 }
 0x133   :  { %v196_v41 = vpop.permute.xlu0 %195 }
 0x134   :  { %v198_v43 = vmul.f32 %v196_v41, %v842_v24 }
 0x136   :  { %v199_v45 = vadd.f32 %v198_v43, %v193_v42  ;;  %v555_v43 = vld [vmem:[%s1076_s4 + $0x78] sm:$0xff] }
 0x137   :  { %560 = vmatpush.msra.mxu1 %v555_v43  ;;  %639 = vmatpush.msra.mxu3 %v555_v43 }
 0x138   :  { %v205_v46 = vadd.f32 %v204_v44, %v199_v45  ;;  %v554_v44 = vld [vmem:[%s1076_s4 + $0x70] sm:$0xff]  ;;  %v553_v45 = vld [vmem:[%s1076_s4 + $0x68] sm:$0xff] }
 0x139   :  { %561 = vmatpush.msra.mxu1 %v554_v44  ;;  %640 = vmatpush.msra.mxu3 %v554_v44 }
 0x13a   :  { %696 = vtanh.f32 %v205_v46  ;;  %v552_v46 = vld [vmem:[%s1076_s4 + $0x60] sm:$0xff] }
 0x13b   :  { %562 = vmatpush.msra.mxu1 %v553_v45  ;;  %641 = vmatpush.msra.mxu3 %v553_v45 }
 0x13d   :  { %563 = vmatpush.msra.mxu1 %v552_v46  ;;  %642 = vmatpush.msra.mxu3 %v552_v46  ;;  %v65_v46 = vld [vmem:[%s1072_s0 + $0x50] sm:$0xff] }
 0x13f   :  { %564 = vmatpush.msra.mxu1 %v551_v48  ;;  %643 = vmatpush.msra.mxu3 %v551_v48 }
 0x140   :  { %v697_v47 = vpop.eup %696 }
 0x141   :  { %218 = vperm.xlu2 %666, %v697_v47   ;;  %212 = vperm.xlu1 %665, %v697_v47  }
 0x149   :  { %667 = vset.pattern.permute.xlu2 %v782_v18 }
 0x14a   :  { %224 = vperm.xlu2 %667, %v697_v47   ;;  %v62_v47 = vld [vmem:[%s1072_s0 + $0x38] sm:$0xff] }
 0x14b   :  { %128 = vmatmul.f32.gmra.mxu2 %v62_v47  ;;  %v66_v47 = vld [vmem:[%s1072_s0 + $0x58] sm:$0xff] }
 0x152   :  { %668 = vset.pattern.permute.xlu2 %v784_v20 }
 0x19b   :  { %v219_v49 = vpop.permute.xlu2 %218 }
 0x19c   :  { %v221_v55 = vmul.f32 %v219_v49, %v842_v24  ;;  %v550_v49 = vld [vmem:[%s1076_s4 + $0x50] sm:$0xff] }
 0x19d   :  { %565 = vmatpush.msra.mxu1 %v550_v49  ;;  %644 = vmatpush.msra.mxu3 %v550_v49 }
 0x19f   :  { %566 = vmatpush.msra.mxu1 %v549_v50  ;;  %645 = vmatpush.msra.mxu3 %v549_v50 }
 0x1a4   :  { %v225_v54 = vpop.permute.xlu2 %224 }
 0x1a5   :  { %v227_v57 = vmul.f32 %v225_v54, %v844_v25  ;;  %v545_v54 = vld [vmem:[%s1076_s4 + $0x28] sm:$0xff] }
 0x1b3   :  { %v213_v52 = vpop.permute.xlu1 %212 }
 0x1b4   :  { %v215_v53 = vmul.f32 %v213_v52, %v835_v22  ;;  %v547_v52 = vld [vmem:[%s1076_s4 + $0x38] sm:$0xff] }
 0x1b6   :  { %v216_v56 = vadd.f32 %v215_v53, %v115_v51  ;;  %v548_v51 = vld [vmem:[%s1076_s4 + $0x40] sm:$0xff]  ;;  %v546_v53 = vld [vmem:[%s1076_s4 + $0x30] sm:$0xff] }
 0x1b7   :  { %567 = vmatpush.msra.mxu1 %v548_v51  ;;  %646 = vmatpush.msra.mxu3 %v548_v51 }
 0x1b8   :  { %v222_v58 = vadd.f32 %v221_v55, %v216_v56  ;;  %v544_v55 = vld [vmem:[%s1076_s4 + $0x20] sm:$0xff]  ;;  %v543_v56 = vld [vmem:[%s1076_s4 + $0x18] sm:$0xff] }
 0x1b9   :  { %568 = vmatpush.msra.mxu1 %v547_v52  ;;  %647 = vmatpush.msra.mxu3 %v547_v52 }
 0x1ba   :  { %v228_v59 = vadd.f32 %v227_v57, %v222_v58  ;;  %v542_v57 = vld [vmem:[%s1076_s4 + $0x10] sm:$0xff]  ;;  %v541_v58 = vld [vmem:[%s1076_s4 + $0x8] sm:$0xff] }
 0x1bb   :  { %569 = vmatpush.msra.mxu1 %v546_v53  ;;  %648 = vmatpush.msra.mxu3 %v546_v53 }
 0x1bc   :  { %698 = vtanh.f32 %v228_v59  ;;  %v540_v59 = vld [vmem:[%s1076_s4] sm:$0xff] }
 0x1bd   :  { %570 = vmatpush.msra.mxu1 %v545_v54  ;;  %649 = vmatpush.msra.mxu3 %v545_v54 }
 0x1bf   :  { %571 = vmatpush.msra.mxu1 %v544_v55  ;;  %650 = vmatpush.msra.mxu3 %v544_v55 }
 0x1c1   :  { %572 = vmatpush.msra.mxu1 %v543_v56  ;;  %651 = vmatpush.msra.mxu3 %v543_v56 }
 0x1c2   :  { %v699_v60 = vpop.eup %698 }
 0x1c3   :  { %247 = vperm.xlu0 %669, %v699_v60   ;;  %241 = vperm.xlu2 %668, %v699_v60  }
 0x1c4   :  { %235 = vperm.xlu1 %665, %v699_v60   ;;  %573 = vmatpush.msra.mxu1 %v542_v57 }
 0x1c5   :  { %652 = vmatpush.msra.mxu3 %v542_v57 }
 0x1c6   :  { %574 = vmatpush.msra.mxu1 %v541_v58 }
 0x1c7   :  { %653 = vmatpush.msra.mxu3 %v541_v58 }
 0x1c8   :  { %575 = vmatpush.msra.mxu1 %v540_v59 }
 0x1c9   :  { %654 = vmatpush.msra.mxu3 %v540_v59 }
 0x1cb   :  { %672 = vset.pattern.permute.xlu0 %v784_v20 }
 0x21d   :  { %v242_v0 = vpop.permute.xlu2 %241 }
 0x21e   :  { %v244_v4 = vmul.f32 %v242_v0, %v842_v24 }
 0x235   :  { %v248_v3 = vpop.permute.xlu0 %247 }
 0x236   :  { %v236_v1 = vpop.permute.xlu1 %235  ;;  %v250_v6 = vmul.f32 %v248_v3, %v844_v25 }
 0x237   :  { %v238_v2 = vmul.f32 %v236_v1, %v835_v22 }
 0x239   :  { %v239_v5 = vadd.f32 %v238_v2, %v118_v63 }
 0x23b   :  { %v245_v7 = vadd.f32 %v244_v4, %v239_v5 }
 0x23d   :  { %v251_v8 = vadd.f32 %v250_v6, %v245_v7 }
 0x23f   :  { %700 = vtanh.f32 %v251_v8  ;;  %v63_v8 = vld [vmem:[%s1072_s0 + $0x40] sm:$0xff] }
 0x240   :  { %131 = vmatmul.f32.gmra.mxu2 %v63_v8 }
 0x245   :  { %v701_v9 = vpop.eup %700 }
 0x246   :  { %264 = vperm.xlu2 %668, %v701_v9   ;;  %258 = vperm.xlu1 %665, %v701_v9  }
 0x248   :  { %134 = vmatmul.f32.gmra.mxu2 %v64_v31 }
 0x24e   :  { %670 = vset.pattern.permute.xlu1 %v782_v18  ;;  %671 = vset.pattern.permute.xlu2 %v783_v19 }
 0x24f   :  { %270 = vperm.xlu1 %670, %v701_v9   ;;  %v129_v9 = vpop.f32.mrf.mxu2 }
 0x250   :  { %v130_v10 = vadd.f32 %v840_v23, %v129_v9  ;;  %137 = vmatmul.f32.gmra.mxu2 %v65_v46 }
 0x258   :  { %140 = vmatmul.f32.gmra.mxu2 %v66_v47 }
 0x2a0   :  { %v265_v16 = vpop.permute.xlu2 %264 }
 0x2a1   :  { %v267_v21 = vmul.f32 %v265_v16, %v842_v24 }
 0x2b8   :  { %v259_v13 = vpop.permute.xlu1 %258 }
 0x2b9   :  { %v261_v15 = vmul.f32 %v259_v13, %v835_v22 }
 0x2bb   :  { %v262_v17 = vadd.f32 %v261_v15, %v121_v14 }
 0x2bd   :  { %v268_v27 = vadd.f32 %v267_v21, %v262_v17 }
 0x2c1   :  { %v271_v26 = vpop.permute.xlu1 %270 }
 0x2c2   :  { %v273_v28 = vmul.f32 %v271_v26, %v844_v25 }
 0x2c4   :  { %v274_v29 = vadd.f32 %v273_v28, %v268_v27  ;;  %v964_v27 = vld [vmem:[%s1077_s5] ss:$0 sm:$0xff] }
 0x2c6   :  { %702 = vtanh.f32 %v274_v29 }
 0x2cc   :  { %v703_v30 = vpop.eup %702 }
 0x2cd   :  { %293 = vperm.xlu1 %670, %v703_v30   ;;  %287 = vperm.xlu0 %672, %v703_v30  }
 0x2ce   :  { %281 = vperm.xlu2 %671, %v703_v30  }
 0x2d5   :  { %673 = vset.pattern.permute.xlu1 %v784_v20  ;;  %675 = vset.pattern.permute.xlu0 %v783_v19 }
 0x328   :  { %v282_v32 = vpop.permute.xlu2 %281 }
 0x329   :  { %v284_v34 = vmul.f32 %v282_v32, %v835_v22  ;;  %v132_v32 = vpop.f32.mrf.mxu2 }
 0x32b   :  { %v285_v37 = vadd.f32 %v284_v34, %v124_v33  ;;  %v133_v33 = vadd.f32 %v840_v23, %v132_v32 }
 0x331   :  { %v135_v48 = vpop.f32.mrf.mxu2 }
 0x332   :  { %v136_v50 = vadd.f32 %v840_v23, %v135_v48 }
 0x33f   :  { %v294_v35 = vpop.permute.xlu1 %293  ;;  %v288_v36 = vpop.permute.xlu0 %287 }
 0x340   :  { %v290_v38 = vmul.f32 %v288_v36, %v842_v24  ;;  %v296_v39 = vmul.f32 %v294_v35, %v844_v25 }
 0x342   :  { %v291_v40 = vadd.f32 %v290_v38, %v285_v37 }
 0x344   :  { %v297_v41 = vadd.f32 %v296_v39, %v291_v40 }
 0x346   :  { %704 = vtanh.f32 %v297_v41 }
 0x34c   :  { %v705_v42 = vpop.eup %704 }
 0x34d   :  { %310 = vperm.xlu1 %673, %v705_v42   ;;  %304 = vperm.xlu2 %671, %v705_v42  }
 0x355   :  { %674 = vset.pattern.permute.xlu2 %v782_v18 }
 0x356   :  { %316 = vperm.xlu2 %674, %v705_v42  }
 0x3a7   :  { %v305_v60 = vpop.permute.xlu2 %304 }
 0x3a8   :  { %v307_v63 = vmul.f32 %v305_v60, %v835_v22 }
 0x3aa   :  { %v308_v2 = vadd.f32 %v307_v63, %v127_v62  ;;  %v138_v62 = vpop.f32.mrf.mxu2 }
 0x3b0   :  { %v317_v0 = vpop.permute.xlu2 %316 }
 0x3b1   :  { %v319_v4 = vmul.f32 %v317_v0, %v844_v25  ;;  %v139_v0 = vadd.f32 %v840_v23, %v138_v62 }
 0x3bf   :  { %v311_v1 = vpop.permute.xlu1 %310 }
 0x3c0   :  { %v313_v3 = vmul.f32 %v311_v1, %v842_v24 }
 0x3c2   :  { %v314_v5 = vadd.f32 %v313_v3, %v308_v2 }
 0x3c4   :  { %v320_v6 = vadd.f32 %v319_v4, %v314_v5 }
 0x3c6   :  { %706 = vtanh.f32 %v320_v6 }
 0x3cc   :  { %v707_v7 = vpop.eup %706 }
 0x3cd   :  { %339 = vperm.xlu2 %674, %v707_v7   ;;  %333 = vperm.xlu1 %673, %v707_v7  }
 0x3ce   :  { %327 = vperm.xlu0 %675, %v707_v7   ;;  %576 = vmatmul.f32.vlgmr.msra.gmra.mxu1 %v707_v7 }
 0x3d5   :  { %677 = vset.pattern.permute.xlu2 %v784_v20  ;;  %676 = vset.pattern.permute.xlu1 %v783_v19 }
 0x3d6   :  { %678 = vset.pattern.permute.xlu0 %v782_v18 }
 0x427   :  { %v340_v14 = vpop.permute.xlu2 %339 }
 0x428   :  { %v342_v17 = vmul.f32 %v340_v14, %v844_v25  ;;  %v141_v14 = vpop.f32.mrf.mxu2 }
 0x43f   :  { %v334_v11 = vpop.permute.xlu1 %333 }
 0x440   :  { %v328_v12 = vpop.permute.xlu0 %327  ;;  %v336_v15 = vmul.f32 %v334_v11, %v842_v24 }
 0x441   :  { %v330_v13 = vmul.f32 %v328_v12, %v835_v22  ;;  %v67_v12 = vld [vmem:[%s1072_s0 + $0x60] sm:$0xff] }
 0x442   :  { %143 = vmatmul.f32.gmra.mxu2 %v67_v12 }
 0x443   :  { %v331_v16 = vadd.f32 %v330_v13, %v130_v10 }
 0x445   :  { %v337_v21 = vadd.f32 %v336_v15, %v331_v16  ;;  %v142_v15 = vadd.f32 %v840_v23, %v141_v14 }
 0x447   :  { %v343_v26 = vadd.f32 %v342_v17, %v337_v21 }
 0x449   :  { %708 = vtanh.f32 %v343_v26 }
 0x44b   :  { %v577_v28 = vpop.f32.mrf.mxu1 }
 0x44c   :  { %v578_v29 = vadd.f32 %v964_v27, %v577_v28 }
 0x44e   :  { %607 = vst [vmem:[%s1078_s6] sm:$0xff] %v578_v29 }
 0x44f   :  { %v709_v30 = vpop.eup %708 }
 0x450   :  { %362 = vperm.xlu0 %678, %v709_v30   ;;  %356 = vperm.xlu2 %677, %v709_v30  }
 0x451   :  { %350 = vperm.xlu1 %676, %v709_v30   ;;  %579 = vmatmul.f32.gmra.mxu1 %v709_v30 }
 0x458   :  { %681 = vset.pattern.permute.xlu0 %v784_v20 }
 0x4aa   :  { %v357_v34 = vpop.permute.xlu2 %356 }
 0x4ab   :  { %v359_v38 = vmul.f32 %v357_v34, %v842_v24 }
 0x4c2   :  { %v363_v37 = vpop.permute.xlu0 %362 }
 0x4c3   :  { %v351_v35 = vpop.permute.xlu1 %350  ;;  %v365_v40 = vmul.f32 %v363_v37, %v844_v25 }
 0x4c4   :  { %v353_v36 = vmul.f32 %v351_v35, %v835_v22  ;;  %v68_v35 = vld [vmem:[%s1072_s0 + $0x68] sm:$0xff] }
 0x4c5   :  { %146 = vmatmul.f32.gmra.mxu2 %v68_v35 }
 0x4c6   :  { %v354_v39 = vadd.f32 %v353_v36, %v133_v33  ;;  %v144_v36 = vpop.f32.mrf.mxu2 }
 0x4c7   :  { %v145_v37 = vadd.f32 %v840_v23, %v144_v36 }
 0x4c8   :  { %v360_v41 = vadd.f32 %v359_v38, %v354_v39 }
 0x4ca   :  { %v366_v42 = vadd.f32 %v365_v40, %v360_v41 }
 0x4cc   :  { %710 = vtanh.f32 %v366_v42 }
 0x4ce   :  { %v580_v43 = vpop.f32.mrf.mxu1 }
 0x4cf   :  { %v581_v44 = vadd.f32 %v964_v27, %v580_v43 }
 0x4d1   :  { %608 = vst [vmem:[%s1078_s6 + $0x8] sm:$0xff] %v581_v44 }
 0x4d2   :  { %v711_v45 = vpop.eup %710 }
 0x4d3   :  { %379 = vperm.xlu2 %677, %v711_v45   ;;  %373 = vperm.xlu1 %676, %v711_v45  }
 0x4d4   :  { %582 = vmatmul.f32.gmra.mxu1 %v711_v45 }
 0x4db   :  { %679 = vset.pattern.permute.xlu1 %v782_v18  ;;  %680 = vset.pattern.permute.xlu2 %v783_v19 }
 0x4dc   :  { %385 = vperm.xlu1 %679, %v711_v45  }
 0x52d   :  { %v380_v52 = vpop.permute.xlu2 %379 }
 0x52e   :  { %v382_v54 = vmul.f32 %v380_v52, %v842_v24 }
 0x545   :  { %v374_v49 = vpop.permute.xlu1 %373 }
 0x546   :  { %v376_v51 = vmul.f32 %v374_v49, %v835_v22 }
 0x548   :  { %v377_v53 = vadd.f32 %v376_v51, %v136_v50  ;;  %v69_v50 = vld [vmem:[%s1072_s0 + $0x70] sm:$0xff]  ;;  %v147_v51 = vpop.f32.mrf.mxu2 }
 0x549   :  { %149 = vmatmul.f32.gmra.mxu2 %v69_v50  ;;  %v148_v52 = vadd.f32 %v840_v23, %v147_v51 }
 0x54a   :  { %v383_v56 = vadd.f32 %v382_v54, %v377_v53 }
 0x54e   :  { %v386_v55 = vpop.permute.xlu1 %385 }
 0x54f   :  { %v388_v57 = vmul.f32 %v386_v55, %v844_v25 }
 0x551   :  { %v389_v58 = vadd.f32 %v388_v57, %v383_v56  ;;  %v583_v59 = vpop.f32.mrf.mxu1 }
 0x552   :  { %v584_v60 = vadd.f32 %v964_v27, %v583_v59 }
 0x553   :  { %712 = vtanh.f32 %v389_v58 }
 0x554   :  { %609 = vst [vmem:[%s1078_s6 + $0x10] sm:$0xff] %v584_v60 }
 0x559   :  { %v713_v61 = vpop.eup %712 }
 0x55a   :  { %408 = vperm.xlu1 %679, %v713_v61   ;;  %402 = vperm.xlu0 %681, %v713_v61  }
 0x55b   :  { %396 = vperm.xlu2 %680, %v713_v61   ;;  %585 = vmatmul.f32.gmra.mxu1 %v713_v61 }
 0x562   :  { %682 = vset.pattern.permute.xlu1 %v784_v20  ;;  %684 = vset.pattern.permute.xlu0 %v783_v19 }
 0x5b5   :  { %v397_v63 = vpop.permute.xlu2 %396 }
 0x5b6   :  { %v399_v1 = vmul.f32 %v397_v63, %v835_v22 }
 0x5b8   :  { %v400_v4 = vadd.f32 %v399_v1, %v139_v0  ;;  %v70_v0 = vld [vmem:[%s1072_s0 + $0x78] sm:$0xff] }
 0x5b9   :  { %152 = vmatmul.f32.gmra.mxu2 %v70_v0 }
 0x5cc   :  { %v409_v2 = vpop.permute.xlu1 %408  ;;  %v403_v3 = vpop.permute.xlu0 %402 }
 0x5cd   :  { %v405_v5 = vmul.f32 %v403_v3, %v842_v24  ;;  %v411_v6 = vmul.f32 %v409_v2, %v844_v25  ;;  %v150_v1 = vpop.f32.mrf.mxu2 }
 0x5ce   :  { %v151_v3 = vadd.f32 %v840_v23, %v150_v1 }
 0x5cf   :  { %v406_v7 = vadd.f32 %v405_v5, %v400_v4 }
 0x5d1   :  { %v412_v8 = vadd.f32 %v411_v6, %v406_v7 }
 0x5d3   :  { %714 = vtanh.f32 %v412_v8 }
 0x5d8   :  { %v586_v9 = vpop.f32.mrf.mxu1 }
 0x5d9   :  { %v715_v10 = vpop.eup %714  ;;  %v587_v11 = vadd.f32 %v964_v27, %v586_v9 }
 0x5da   :  { %425 = vperm.xlu1 %682, %v715_v10   ;;  %419 = vperm.xlu2 %680, %v715_v10  }
 0x5db   :  { %610 = vst [vmem:[%s1078_s6 + $0x18] sm:$0xff] %v587_v11  ;;  %588 = vmatmul.f32.gmra.mxu1 %v715_v10 }
 0x5e2   :  { %683 = vset.pattern.permute.xlu2 %v782_v18 }
 0x5e3   :  { %431 = vperm.xlu2 %683, %v715_v10  }
 0x634   :  { %v420_v13 = vpop.permute.xlu2 %419 }
 0x635   :  { %v422_v16 = vmul.f32 %v420_v13, %v835_v22 }
 0x637   :  { %v423_v26 = vadd.f32 %v422_v16, %v142_v15 }
 0x63c   :  { %v153_v14 = vpop.f32.mrf.mxu2 }
 0x63d   :  { %v432_v17 = vpop.permute.xlu2 %431  ;;  %v154_v16 = vadd.f32 %v840_v23, %v153_v14 }
 0x63e   :  { %v434_v29 = vmul.f32 %v432_v17, %v844_v25 }
 0x64c   :  { %v426_v21 = vpop.permute.xlu1 %425 }
 0x64d   :  { %v428_v28 = vmul.f32 %v426_v21, %v842_v24 }
 0x64f   :  { %v429_v30 = vadd.f32 %v428_v28, %v423_v26 }
 0x651   :  { %v435_v31 = vadd.f32 %v434_v29, %v429_v30 }
 0x653   :  { %716 = vtanh.f32 %v435_v31 }
 0x658   :  { %v589_v32 = vpop.f32.mrf.mxu1 }
 0x659   :  { %v717_v33 = vpop.eup %716  ;;  %v590_v34 = vadd.f32 %v964_v27, %v589_v32 }
 0x65a   :  { %454 = vperm.xlu2 %683, %v717_v33   ;;  %448 = vperm.xlu1 %682, %v717_v33  }
 0x65b   :  { %611 = vst [vmem:[%s1078_s6 + $0x20] sm:$0xff] %v590_v34  ;;  %442 = vperm.xlu0 %684, %v717_v33   ;;  %591 = vmatmul.f32.gmra.mxu1 %v717_v33 }
 0x662   :  { %686 = vset.pattern.permute.xlu2 %v784_v20  ;;  %685 = vset.pattern.permute.xlu1 %v783_v19 }
 0x663   :  { %687 = vset.pattern.permute.xlu0 %v782_v18 }
 0x6b4   :  { %v455_v41 = vpop.permute.xlu2 %454 }
 0x6b5   :  { %v457_v44 = vmul.f32 %v455_v41, %v844_v25 }
 0x6cc   :  { %v449_v38 = vpop.permute.xlu1 %448 }
 0x6cd   :  { %v443_v39 = vpop.permute.xlu0 %442  ;;  %v451_v42 = vmul.f32 %v449_v38, %v842_v24 }
 0x6ce   :  { %v445_v40 = vmul.f32 %v443_v39, %v835_v22 }
 0x6d0   :  { %v446_v43 = vadd.f32 %v445_v40, %v145_v37 }
 0x6d2   :  { %v452_v45 = vadd.f32 %v451_v42, %v446_v43 }
 0x6d4   :  { %v458_v46 = vadd.f32 %v457_v44, %v452_v45 }
 0x6d6   :  { %718 = vtanh.f32 %v458_v46 }
 0x6d8   :  { %v592_v47 = vpop.f32.mrf.mxu1 }
 0x6d9   :  { %v593_v48 = vadd.f32 %v964_v27, %v592_v47 }
 0x6db   :  { %612 = vst [vmem:[%s1078_s6 + $0x28] sm:$0xff] %v593_v48 }
 0x6dc   :  { %v719_v49 = vpop.eup %718 }
 0x6dd   :  { %477 = vperm.xlu0 %687, %v719_v49   ;;  %471 = vperm.xlu2 %686, %v719_v49  }
 0x6de   :  { %465 = vperm.xlu1 %685, %v719_v49   ;;  %594 = vmatmul.f32.gmra.mxu1 %v719_v49 }
 0x6e5   :  { %690 = vset.pattern.permute.xlu0 %v784_v20 }
 0x737   :  { %v472_v53 = vpop.permute.xlu2 %471 }
 0x738   :  { %v474_v57 = vmul.f32 %v472_v53, %v842_v24 }
 0x74f   :  { %v478_v56 = vpop.permute.xlu0 %477 }
 0x750   :  { %v466_v54 = vpop.permute.xlu1 %465  ;;  %v480_v59 = vmul.f32 %v478_v56, %v844_v25 }
 0x751   :  { %v468_v55 = vmul.f32 %v466_v54, %v835_v22 }
 0x753   :  { %v469_v58 = vadd.f32 %v468_v55, %v148_v52 }
 0x755   :  { %v475_v60 = vadd.f32 %v474_v57, %v469_v58 }
 0x757   :  { %v481_v20 = vadd.f32 %v480_v59, %v475_v60 }
 0x759   :  { %720 = vtanh.f32 %v481_v20 }
 0x75b   :  { %v595_v61 = vpop.f32.mrf.mxu1 }
 0x75c   :  { %v596_v62 = vadd.f32 %v964_v27, %v595_v61 }
 0x75e   :  { %613 = vst [vmem:[%s1078_s6 + $0x30] sm:$0xff] %v596_v62 }
 0x75f   :  { %v721_v63 = vpop.eup %720 }
 0x760   :  { %494 = vperm.xlu2 %686, %v721_v63   ;;  %488 = vperm.xlu1 %685, %v721_v63  }
 0x761   :  { %597 = vmatmul.f32.vlgmr.msra.gmra.mxu3 %v721_v63 }
 0x768   :  { %688 = vset.pattern.permute.xlu1 %v782_v18  ;;  %689 = vset.pattern.permute.xlu2 %v783_v19 }
 0x769   :  { %500 = vperm.xlu1 %688, %v721_v63  }
 0x7ba   :  { %v495_v5 = vpop.permute.xlu2 %494 }
 0x7bb   :  { %v497_v7 = vmul.f32 %v495_v5, %v842_v24 }
 0x7d2   :  { %v489_v2 = vpop.permute.xlu1 %488 }
 0x7d3   :  { %v491_v4 = vmul.f32 %v489_v2, %v835_v22 }
 0x7d5   :  { %v492_v6 = vadd.f32 %v491_v4, %v151_v3 }
 0x7d7   :  { %v498_v9 = vadd.f32 %v497_v7, %v492_v6 }
 0x7db   :  { %v501_v8 = vpop.permute.xlu1 %500 }
 0x7dc   :  { %v503_v19 = vmul.f32 %v501_v8, %v844_v25 }
 0x7de   :  { %v504_v10 = vadd.f32 %v503_v19, %v498_v9 }
 0x7e0   :  { %722 = vtanh.f32 %v504_v10 }
 0x7e4   :  { %v598_v11 = vpop.f32.mrf.mxu3 }
 0x7e5   :  { %v599_v12 = vadd.f32 %v964_v27, %v598_v11 }
 0x7e6   :  { %v723_v13 = vpop.eup %722 }
 0x7e7   :  { %614 = vst [vmem:[%s1078_s6 + $0x38] sm:$0xff] %v599_v12  ;;  %523 = vperm.xlu1 %688, %v723_v13   ;;  %517 = vperm.xlu0 %690, %v723_v13  }
 0x7e8   :  { %511 = vperm.xlu2 %689, %v723_v13   ;;  %600 = vmatmul.f32.gmra.mxu3 %v723_v13 }
 0x7ef   :  { %691 = vset.pattern.permute.xlu0 %v782_v18 }
 0x842   :  { %v512_v15 = vpop.permute.xlu2 %511 }
 0x843   :  { %v514_v17 = vmul.f32 %v512_v15, %v835_v22 }
 0x845   :  { %v515_v28 = vadd.f32 %v514_v17, %v154_v16 }
 0x859   :  { %v524_v21 = vpop.permute.xlu1 %523  ;;  %v518_v26 = vpop.permute.xlu0 %517 }
 0x85a   :  { %v520_v29 = vmul.f32 %v518_v26, %v842_v24  ;;  %v526_v30 = vmul.f32 %v524_v21, %v844_v25 }
 0x85c   :  { %v521_v31 = vadd.f32 %v520_v29, %v515_v28 }
 0x85e   :  { %v527_v32 = vadd.f32 %v526_v30, %v521_v31 }
 0x860   :  { %724 = vtanh.f32 %v527_v32 }
 0x866   :  { %v725_v33 = vpop.eup %724 }
 0x867   :  { %603 = vmatmul.f32.gmra.mxu3 %v725_v33 }
 0x86b   :  { %v601_v34 = vpop.f32.mrf.mxu3 }
 0x86c   :  { %v602_v18 = vadd.f32 %v964_v27, %v601_v34 }
 0x86e   :  { %615 = vst [vmem:[%s1078_s6 + $0x40] sm:$0xff] %v602_v18 }
 0x8ea   :  { %v604_v22 = vpop.f32.mrf.mxu3 }
 0x8eb   :  { %v605_v23 = vadd.f32 %v964_v27, %v604_v22 }
 0x8ed   :  { %616 = vst [vmem:[%s1078_s6 + $0x48] sm:$0xff] %v605_v23 }
 0x8ee   :  { %621 = vsyncpa [#allocation4], 1 }
 0x8ef   :  { %622 = vsyncpa [#allocation6], 1 }

</bundles_post_ra>
